<compile_context>
chip_gen: v7x
topology: tpu7x:2x2x1
jax: 0.10.0
libtpu: 0.0.40
codegen_flags: <defaults>
</compile_context>

<pallas_src>
import functools

import jax
import jax.numpy as jnp
from jax.experimental import pallas as pl
from jax.experimental.pallas import tpu as pltpu


def _round_up(a, b):
    return ((a + b - 1) // b) * b


def _cdiv(a, b):
    return (a + b - 1) // b


# ----------------------- Kernel 1: impulse response (VPU/EUP) ----------------
def _impulse_kernel(params_ref, noise_ref, h_ref, *, length, inv_sr):
    decay = params_ref[0]                      # scalars from SMEM
    wet = params_ref[1]
    # numerically stable softplus(-decay) = max(-decay, 0) + log1p(exp(-|decay|))
    sp = jnp.maximum(-decay, 0.0) + jnp.log1p(jnp.exp(-jnp.abs(decay)))
    rows, cols = h_ref.shape
    r = jax.lax.broadcasted_iota(jnp.int32, (rows, cols), 0)
    c = jax.lax.broadcasted_iota(jnp.int32, (rows, cols), 1)
    k = r * cols + c                           # flat tap index
    t = k.astype(jnp.float32) * inv_sr         # t generated in-kernel (no DMA)
    env = jnp.exp(-sp * t * 500.0)
    h = noise_ref[...] * env * jax.nn.sigmoid(wet)
    h = jnp.where(k == 0, jnp.float32(1.0), h)           # impulse[0] = 1
    h_ref[...] = jnp.where(k < length, h, jnp.float32(0.0))  # zero past length


def build_impulse_pallas(params, noise_tiles, *, length, sampling_rate):
    rows, cols = noise_tiles.shape
    kernel = functools.partial(_impulse_kernel, length=length,
                               inv_sr=1.0 / float(sampling_rate))
    return pl.pallas_call(
        kernel,
        out_shape=jax.ShapeDtypeStruct((rows, cols), jnp.float32),
        in_specs=[
            pl.BlockSpec(memory_space=pltpu.MemorySpace.SMEM),   # (2,) decay, wet
            pl.BlockSpec(memory_space=pltpu.MemorySpace.VMEM),   # (8, C) noise
        ],
        out_specs=pl.BlockSpec(memory_space=pltpu.MemorySpace.VMEM),
    )(params, noise_tiles)


# ------------------- Kernel 2: banded block-convolution matmul ---------------
def _banded_matmul_kernel(w_ref, g_ref, o_ref, acc_ref):
    d = pl.program_id(1)                       # diagonal (reduction) block

    @pl.when(d == 0)
    def _():
        acc_ref[...] = jnp.zeros_like(acc_ref)

    acc_ref[...] += jnp.dot(w_ref[...], g_ref[...],
                            preferred_element_type=jnp.float32)

    @pl.when(d == pl.num_programs(1) - 1)
    def _():
        o_ref[...] = acc_ref[...].astype(o_ref.dtype)


def banded_conv_pallas(w_rows, g, *, tm, tb):
    # w_rows: (R_pad, D*TB) compute dtype, g: (D*TB, TB) compute dtype
    r_pad, k_tot = w_rows.shape
    d_blocks = k_tot // tb
    grid = (r_pad // tm, d_blocks)
    cost = pl.CostEstimate(
        flops=2 * r_pad * k_tot * tb,
        transcendentals=0,
        bytes_accessed=(w_rows.size * w_rows.dtype.itemsize
                        + g.size * g.dtype.itemsize
                        + r_pad * tb * 4),
    )
    return pl.pallas_call(
        _banded_matmul_kernel,
        out_shape=jax.ShapeDtypeStruct((r_pad, tb), jnp.float32),
        grid_spec=pltpu.PrefetchScalarGridSpec(
            num_scalar_prefetch=0,
            grid=grid,
            in_specs=[
                pl.BlockSpec((tm, tb), lambda r, d: (r, d)),   # W row tile, K block
                pl.BlockSpec((tb, tb), lambda r, d: (d, 0)),   # Toeplitz band block
            ],
            out_specs=pl.BlockSpec((tm, tb), lambda r, d: (r, 0)),
            scratch_shapes=[pltpu.VMEM((tm, tb), jnp.float32)],
        ),
        compiler_params=pltpu.CompilerParams(
            # row tiles split across TensorCores (v7x); reduction axis serial
            dimension_semantics=("parallel", "arbitrary"),
            # explicit, small budget: fits v5e's 16 MiB default and v7x's 64 MiB
            vmem_limit_bytes=32 * 1024 * 1024,
        ),
        cost_estimate=cost,
    )(w_rows, g)


# ----------------------------------- Reverb ----------------------------------
class ReverbPallas:
    def __init__(self, length, sampling_rate, initial_wet=0.0, initial_decay=4.5,
                 key=None, compute_dtype=jnp.bfloat16, tile_rows=256, tile_cols=512):
        assert tile_cols % 128 == 0 and tile_rows % 8 == 0
        self.length = length
        self.sampling_rate = sampling_rate
        self.compute_dtype = compute_dtype
        self.tile_rows = tile_rows          # TM (matmul row tile)
        self.tile_cols = tile_cols          # TB (output samples per block, lanes)

        key = jax.random.PRNGKey(1) if key is None else key
        # nn.Parameter((torch.rand(length) * 2 - 1).unsqueeze(-1)) -> (length,)
        self.noise = jax.random.uniform(key, (length,), jnp.float32) * 2.0 - 1.0
        self.decay = jnp.float32(initial_decay)
        self.wet = jnp.float32(initial_wet)
        self.t = jnp.arange(length, dtype=jnp.float32) / float(sampling_rate)

        # (8, C) sublane-dense layout for kernel 1, padded ONCE here (no per-call pad)
        cols = _round_up(_cdiv(length, 8), 128)
        self._noise_tiles = jnp.pad(self.noise,
                                    (0, 8 * cols - length)).reshape(8, cols)

    def build_impulse(self):
        params = jnp.stack([self.decay, self.wet])          # (2,) -> SMEM
        return build_impulse_pallas(params, self._noise_tiles,
                                    length=self.length,
                                    sampling_rate=self.sampling_rate)

    def __call__(self, x):
        # x: (B, T, 1) float32, T >= self.length
        B, T, _ = x.shape
        L, TB = self.length, self.tile_cols
        cdt = self.compute_dtype

        # Pallas kernel 1: impulse taps, flat row (zeros past L)
        h_full = self.build_impulse().reshape(-1)

        # geometry of the banded block convolution
        D = _cdiv(max(L - 1, 0), TB) + 1       # non-zero diagonal blocks (band width)
        T_pad = _round_up(T, TB)
        nb = T_pad // TB                       # output blocks per batch item
        R = B * nb                             # matmul rows
        TM = min(self.tile_rows, _round_up(R, 8))
        R_pad = _round_up(R, TM)

        # Banded Toeplitz matrix: G[q, n] = impulse[(D-1)*TB + n - q]  (O(L*TB) glue)
        # TODO(synk): generate these (TB, TB) band tiles inside the matmul kernel
        # from the impulse row (per-sublane shifted loads) to drop this glue gather.
        q = jnp.arange(D * TB)[:, None]
        n = jnp.arange(TB)[None, :]
        kk = (D - 1) * TB + n - q
        valid = (kk >= 0) & (kk < L)
        g = jnp.where(valid, h_full[jnp.clip(kk, 0, h_full.shape[0] - 1)], 0.0)
        g = g.astype(cdt)

        # Overlap-save signal matrix: row (b, j) holds the D*TB input samples that
        # feed output block j:  W[b, j, d*TB + m] = x_pad[b, (j + d)*TB + m]
        x_bt = x[..., 0]
        x_p = jnp.pad(x_bt, ((0, 0), ((D - 1) * TB, T_pad - T)))
        w = jnp.concatenate(
            [x_p[:, d * TB:(d + nb) * TB].reshape(B, nb, TB) for d in range(D)],
            axis=-1)                                          # (B, nb, D*TB)
        w_rows = w.reshape(R, D * TB).astype(cdt)
        w_rows = jnp.pad(w_rows, ((0, R_pad - R), (0, 0)))    # pad rows to TM mult.

        # Pallas kernel 2: tiled banded matmul on the MXU  (M = B*T/TB rows)
        y_rows = banded_conv_pallas(w_rows, g, tm=TM, tb=TB)  # (R_pad, TB) f32

        y = y_rows[:R].reshape(B, nb * TB)[:, :T]             # crop padding
        return y[..., None]                                   # (B, T, 1)


# ------------------------------ pure-JAX reference ---------------------------
def reference_impulse(noise, decay, wet, t):
    sp = jnp.logaddexp(0.0, -decay)                           # softplus(-decay)
    imp = noise * jnp.exp(-sp * t * 500.0) * jax.nn.sigmoid(wet)
    return imp.at[0].set(1.0)


def reference_forward(x, noise, decay, wet, t, length):
    """Mirrors the PyTorch module (FFT-based fft_convolve)."""
    imp = reference_impulse(noise, decay, wet, t)
    T = x.shape[1]
    imp = jnp.pad(imp, (0, T - length))
    sig = jnp.pad(x[..., 0], ((0, 0), (0, T)))
    ker = jnp.pad(imp, (T, 0))
    out = jnp.fft.irfft(jnp.fft.rfft(sig) * jnp.fft.rfft(ker)[None, :])
    out = out[..., out.shape[-1] // 2:]
    return out[..., None].astype(jnp.float32)


if __name__ == "__main__":
    B, T = 4, 600            # batch, signal length (deliberately not tile-aligned)
    LENGTH, SR = 100, 16000  # impulse length, sampling rate

    kx, kn = jax.random.split(jax.random.PRNGKey(0))
    x = jax.random.normal(kx, (B, T, 1), dtype=jnp.float32)

    # small tiles so the toy test exercises a real grid: 3 row tiles x 2 diag blocks
    reverb = ReverbPallas(LENGTH, SR, initial_wet=0.0, initial_decay=4.5, key=kn,
                          compute_dtype=jnp.bfloat16, tile_rows=8, tile_cols=128)

    # 1) impulse kernel vs pure-JAX reference (both f32, tight)
    h = jax.block_until_ready(reverb.build_impulse()).reshape(-1)[:LENGTH]
    h_ref = reference_impulse(reverb.noise, reverb.decay, reverb.wet, reverb.t)
    assert jnp.max(jnp.abs(h - h_ref)) < 1e-5, "impulse kernel mismatch"

    # 2) end-to-end bf16 MXU path vs FFT reference (f32-accumulated bf16 operands)
    y = jax.block_until_ready(reverb(x))
    y_ref = reference_forward(x, reverb.noise, reverb.decay, reverb.wet,
                              reverb.t, LENGTH)
    assert y.shape == (B, T, 1)
    scale = jnp.maximum(1.0, jnp.max(jnp.abs(y_ref)))
    err_bf16 = float(jnp.max(jnp.abs(y - y_ref)) / scale)
    assert err_bf16 < 2e-2, f"bf16 conv mismatch: rel err {err_bf16}"

    # 3) end-to-end f32-operand path vs FFT reference (tighter)
    reverb_f32 = ReverbPallas(LENGTH, SR, initial_wet=0.0, initial_decay=4.5,
                              key=kn, compute_dtype=jnp.float32,
                              tile_rows=8, tile_cols=128)
    y32 = jax.block_until_ready(reverb_f32(x))
    err_f32 = float(jnp.max(jnp.abs(y32 - y_ref)) / scale)
    assert err_f32 < 1e-2, f"f32 conv mismatch: rel err {err_f32}"

    print("KERNEL_OK")
</pallas_src>

<mosaic_0001>
module attributes {stable_mosaic.version = 11 : i64} {
  func.func @_impulse_kernel(%arg0: memref<2xf32, #tpu.memory_space<smem>>, %arg1: memref<8x128xf32, #tpu.memory_space<vmem>>, %arg2: memref<8x128xf32, #tpu.memory_space<vmem>>) attributes {dimension_semantics = [], scalar_prefetch = 0 : i64, scratch_operands = 0 : i64, tpu.core_type = #tpu.core_type<tc>} {
    %c0 = arith.constant 0 : index
    %0 = memref.load %arg0[%c0] : memref<2xf32, #tpu.memory_space<smem>>
    %c1 = arith.constant 1 : index
    %1 = memref.load %arg0[%c1] : memref<2xf32, #tpu.memory_space<smem>>
    %cst = arith.constant 0.000000e+00 : f32
    %2 = arith.subf %cst, %0 : f32
    %cst_0 = arith.constant 0.000000e+00 : f32
    %3 = arith.maximumf %2, %cst_0 : f32
    %4 = math.absf %0 : f32
    %cst_1 = arith.constant 0.000000e+00 : f32
    %5 = arith.subf %cst_1, %4 : f32
    %6 = math.exp %5 : f32
    %7 = math.log1p %6 : f32
    %8 = arith.addf %3, %7 : f32
    %9 = tpu.iota {dimensions = array<i32: 0>} : vector<8x128xi32>
    %10 = tpu.iota {dimensions = array<i32: 1>} : vector<8x128xi32>
    %c128_i32 = arith.constant 128 : i32
    %11 = vector.broadcast %c128_i32 : i32 to vector<8x128xi32>
    %12 = arith.muli %9, %11 : vector<8x128xi32>
    %13 = arith.addi %12, %10 : vector<8x128xi32>
    %14 = arith.sitofp %13 : vector<8x128xi32> to vector<8x128xf32>
    %cst_2 = arith.constant 6.250000e-05 : f32
    %15 = vector.broadcast %cst_2 : f32 to vector<8x128xf32>
    %16 = arith.mulf %14, %15 : vector<8x128xf32>
    %cst_3 = arith.constant 0.000000e+00 : f32
    %17 = arith.subf %cst_3, %8 : f32
    %18 = vector.broadcast %17 : f32 to vector<8x128xf32>
    %19 = arith.mulf %18, %16 : vector<8x128xf32>
    %cst_4 = arith.constant 5.000000e+02 : f32
    %20 = vector.broadcast %cst_4 : f32 to vector<8x128xf32>
    %21 = arith.mulf %19, %20 : vector<8x128xf32>
    %22 = math.exp %21 : vector<8x128xf32>
    %c0_5 = arith.constant 0 : index
    %c0_6 = arith.constant 0 : index
    %23 = vector.load %arg1[%c0_5, %c0_6] : memref<8x128xf32, #tpu.memory_space<vmem>>, vector<8x128xf32>
    %24 = arith.mulf %23, %22 : vector<8x128xf32>
    %25 = arith.negf %1 : f32
    %26 = math.exp %25 : f32
    %cst_7 = arith.constant 1.000000e+00 : f32
    %27 = arith.addf %cst_7, %26 : f32
    %28 = arith.divf %cst_7, %27 : f32
    %29 = vector.broadcast %28 : f32 to vector<8x128xf32>
    %30 = arith.mulf %24, %29 : vector<8x128xf32>
    %c0_i32 = arith.constant 0 : i32
    %31 = vector.broadcast %c0_i32 : i32 to vector<8x128xi32>
    %32 = arith.cmpi eq, %13, %31 : vector<8x128xi32>
    %cst_8 = arith.constant 1.000000e+00 : f32
    %33 = vector.broadcast %cst_8 : f32 to vector<8x128xf32>
    %34 = arith.select %32, %33, %30 : vector<8x128xi1>, vector<8x128xf32>
    %c100_i32 = arith.constant 100 : i32
    %35 = vector.broadcast %c100_i32 : i32 to vector<8x128xi32>
    %36 = arith.cmpi slt, %13, %35 : vector<8x128xi32>
    %cst_9 = arith.constant 0.000000e+00 : f32
    %37 = vector.broadcast %cst_9 : f32 to vector<8x128xf32>
    %38 = arith.select %36, %34, %37 : vector<8x128xi1>, vector<8x128xf32>
    %c0_10 = arith.constant 0 : index
    %c0_11 = arith.constant 0 : index
    %39 = vector.load %arg2[%c0_10, %c0_11] : memref<8x128xf32, #tpu.memory_space<vmem>>, vector<8x128xf32>
    tpu.vector_store %arg2[%c0_10, %c0_11], %38 {strides = array<i32>} : memref<8x128xf32, #tpu.memory_space<vmem>>, vector<8x128xf32>,
    return
  }
}

</mosaic_0001>

<bundles_post_ra>
// kernel: tpu_custom_call.1
= control target key start
LH: loop header
LB: loop body
LE: loop exit
PB: predicated region body
PF: predicated region fallthrough
CT: control target
= control target key end

     0   :  { %7 = vsyncpa [#allocation5], 0  ;;  %s247_s0 = inlined_call_operand.hbm [shape: f32[2], index: 0, kind: input, shape index: {}]   ;;  %s248_s1 = inlined_call_operand.hbm [shape: f32[8,128], index: 1, kind: input, shape index: {}]   ;;  %s249_s2 = inlined_call_operand.hbm [shape: f32[8,128], index: 2, kind: output, shape index: {}]  }
   0x1   :  { %8 = vsyncpa [#allocation3], 0 }
   0x2   :  { %9 = vsyncpa [#allocation4], 0  ;;  %s128_s11 = scalar_lea.hbm %s247_s0, 16 }
   0x3   :  { %p129_p0 = scmp.ne.s32.totalorder %s247_s0, %s128_s11  ;;  %p132_p1 = scmp.lt.u32.totalorder %s128_s11, %s247_s0 }
   0x5   :  { %p134_p2 = pnand %p132_p1, %p129_p0 }
   0x7   :  { %137 = shalt.err (!%p134_p2)
}
   0x8   :  { %s188_s16 = smov [#allocation2]   ;;  %s189_s19 = smov [#allocation6]  }
   0x9   :  { %17 = dma.hbm_to_smem %s247_s0, 16, %s188_s16, [#allocation5]  }
   0xa   :  { %s24_s20 = sshll.u32 %s189_s19, 4  ;;  %s138_s23 = scalar_lea.hbm %s248_s1, 128  ;;  %s25_s20 = int_to_ptr.vmem [resolvable:$true] %s24_s20 }
   0xb   :  { %p139_p3 = scmp.ne.s32.totalorder %s248_s1, %s138_s23  ;;  %p142_p4 = scmp.lt.u32.totalorder %s138_s23, %s248_s1 }
   0xd   :  { %p144_p5 = pnand %p142_p4, %p139_p3 }
   0xf   :  { %147 = shalt.err (!%p144_p5)
}
  0x10   :  { %s148_s28 = scalar_lea.vmem %s25_s20, 128  ;;  %p153_p7 = scmp.lt.s32.totalorder %s25_s20, %s25_s20 }
  0x11   :  { %p149_p6 = scmp.ne.s32.totalorder %s25_s20, %s148_s28  ;;  %p154_p8 = scmp.lt.s32.totalorder %s148_s28, %s148_s28 }
  0x13   :  { %p155_p9 = por %p154_p8, %p153_p7 }
  0x15   :  { %p156_p10 = pnand %p155_p9, %p149_p6 }
  0x17   :  { %159 = shalt.err (!%p156_p10)
}
  0x18   :  { %27 = dma.hbm_to_vmem [thread:$0]  %s248_s1, 128, %s25_s20, [#allocation3]  }
  0x19   :  { %182 = dma.done.wait [#allocation5], 16  }
  0x1a   :  { %183 = vsyncadd [#allocation5], 4294967280 }
  0x1b   :  { %184 = dma.done.wait [#allocation3], 128  }
  0x1c   :  { %185 = vsyncadd [#allocation3], 4294967168 }
  0x1d   :  { %34 = sfence }
  0x1e   :  { %s231_s30 = sld [smem:[#allocation2]]  ;;  %s105_s5 = sld [smem:[#allocation2 + $0x1]]  ;;  %v57_v17 = vlaneseq  ;;  %v71_v29 = vld [vmem:[#allocation6] sm:$0xff] }
  0x1f   :  { %s190_s11 = smov 0.0   ;;  %s191_s16 = smov [#allocation7]  }
  0x20   :  { %v58_v18 = vshrl.u32 %v57_v17, 7  ;;  %v60_v19 = vand.u32 127, %v57_v17  ;;  %s95_s17 = sshll.u32 %s191_s16, 4  ;;  %s96_s17 = int_to_ptr.vmem [resolvable:$true] %s95_s17 }
  0x21   :  { %s160_s18 = scalar_lea.vmem %s96_s17, 128  ;;  %p165_p12 = scmp.lt.s32.totalorder %s96_s17, %s96_s17 }
  0x22   :  { %v61_v20 = vmul.u32 128, %v58_v18  ;;  %p161_p11 = scmp.ne.s32.totalorder %s96_s17, %s160_s18  ;;  %p166_p13 = scmp.lt.s32.totalorder %s160_s18, %s160_s18 }
  0x24   :  { %s39_s3 = sand.u32 2147483647, %s231_s30  ;;  %s73_s6 = sxor.u32 2147483648, %s105_s5  ;;  %v62_v21 = vadd.s32 %v61_v20, %v60_v19 }
  0x25   :  { %s40_s4 = ssub.f32 0.0, %s39_s3  ;;  %v74_v3 = vstv %s73_s6  ;;  %p167_p0 = por %p166_p13, %p165_p12 }
  0x26   :  { %v75_v6 = vmul.f32 1.442695, %v74_v3  ;;  %s37_s10 = ssub.f32 0.0, %s231_s30  ;;  %v63_v22 = vcvt.s32.f32 %v62_v21  ;;  %vm84_vm1 = vcmp.eq.s32.totalorder %v62_v21, 0  ;;  %vm86_vm2 = vcmp.lt.s32.totalorder %v62_v21, 100 }
  0x27   :  { %v41_v0 = vstv %s40_s4  ;;  %p168_p1 = pnand %p167_p0, %p161_p11 }
  0x28   :  { %v42_v1 = vmul.f32 1.442695, %v41_v0  ;;  %s38_s12 = smax.f32 %s190_s11, %s37_s10  ;;  %v64_v23 = vmul.f32 6.25e-05, %v63_v22 }
  0x2a   :  { %118 = vpow2.f32 %v42_v1 }
  0x34   :  { %v119_v2 = vpop.eup %118 }
  0x35   :  { %106 = vpush %v119_v2 }
  0x66   :  { %s107_s7 = spop %106 }
  0x67   :  { %v45_v4 = vstv %s107_s7 }
  0x68   :  { %v46_v5 = vadd.f32 1.0, %v45_v4  ;;  %v49_v7 = vmul.f32 -0.5, %v45_v4  ;;  %v52_v9 = vand.u32 2147483647, %v45_v4 }
  0x6a   :  { %120 = vlog2.f32 %v46_v5  ;;  %v50_v8 = vadd.f32 1.0, %v49_v7  ;;  %vm53_vm0 = vcmp.lt.f32.partialorder %v52_v9, 0.0004427343 }
  0x6b   :  { %122 = vpow2.f32 %v75_v6 }
  0x6c   :  { %v51_v11 = vmul.f32 %v50_v8, %v45_v4 }
  0x74   :  { %v121_v10 = vpop.eup %120 }
  0x75   :  { %v48_v12 = vmul.f32 0.6931472, %v121_v10  ;;  %v123_v13 = vpop.eup %122 }
  0x77   :  { %v54_v14 = vsel %vm53_vm0, %v51_v11, %v48_v12 }
  0x78   :  { %108 = vpush %v54_v14 }
  0x79   :  { %110 = vpush %v123_v13 }
  0xa9   :  { %s109_s1 = spop %108 }
  0xaa   :  { %s111_s8 = spop %110  ;;  %s56_s13 = sadd.f32 %s109_s1, %s38_s12 }
  0xab   :  { %s78_s9 = sadd.f32 1.0, %s111_s8 }
  0xac   :  { %s65_s14 = ssub.f32 0.0, %s56_s13 }
  0xad   :  { %v79_v15 = vstv %s78_s9 }
  0xae   :  { %124 = vrcp.f32 %v79_v15  ;;  %v66_v24 = vstv %s65_s14 }
  0xaf   :  { %v67_v25 = vmul.f32 %v66_v24, %v64_v23 }
  0xb1   :  { %v68_v26 = vmul.f32 500.0, %v67_v25 }
  0xb3   :  { %v69_v27 = vmul.f32 1.442695, %v68_v26 }
  0xb5   :  { %126 = vpow2.f32 %v69_v27 }
  0xb8   :  { %v125_v16 = vpop.eup %124 }
  0xb9   :  { %112 = vpush %v125_v16 }
  0xbf   :  { %v127_v28 = vpop.eup %126 }
  0xc0   :  { %v72_v30 = vmul.f32 %v127_v28, %v71_v29 }
  0xea   :  { %s113_s15 = spop %112 }
  0xeb   :  { %v82_v31 = vstv %s113_s15 }
  0xec   :  { %v83_v32 = vmul.f32 %v82_v31, %v72_v30 }
  0xee   :  { %v85_v33 = vsel %vm84_vm1, 1.0, %v83_v32 }
  0xef   :  { %v87_v34 = vsel %vm86_vm2, %v85_v33, 0.0 }
  0xf0   :  { %88 = vst [vmem:[#allocation7] sm:$0xff] %v87_v34 }
  0xf1   :  { %171 = shalt.err (!%p168_p1)
}
  0xf2   :  { %s172_s21 = scalar_lea.hbm %s249_s2, 128 }
  0xf3   :  { %p173_p2 = scmp.ne.s32.totalorder %s249_s2, %s172_s21  ;;  %p176_p3 = scmp.lt.u32.totalorder %s172_s21, %s249_s2 }
  0xf5   :  { %p178_p4 = pnand %p176_p3, %p173_p2 }
  0xf7   :  { %181 = shalt.err (!%p178_p4)
}
  0xf8   :  { %98 = dma.vmem_to_hbm [thread:$0]  %s96_s17, 128, %s249_s2, [#allocation4]  }
  0xf9   :  { %186 = dma.done.wait [#allocation4], 128  }
  0xfa   :  { %187 = vsyncadd [#allocation4], 4294967168 }
  0xfb   :  { %102 = vsyncpa [#allocation3], 1 }
  0xfc   :  { %103 = vsyncpa [#allocation4], 1 }
  0xfd   :  { %104 = vsyncpa [#allocation5], 1 }

</bundles_post_ra>
